<compile_context>
chip_gen: v6e
topology: v6e:2x2x1
jax: 0.10.0
libtpu: 0.0.40
codegen_flags: <defaults>
</compile_context>

<pallas_src>
import numpy as np
import jax
import jax.numpy as jnp
from jax.experimental import pallas as pl
from jax.experimental.pallas import tpu as pltpu

# Fixed sizes implied by the module: Conv1d(k=4) flattening to 10*6 => L=9.
L_IN, KSZ, C_OUT = 9, 4, 10
T_CONV = L_IN - KSZ + 1            # 6
H0 = C_OUT * T_CONV                # 60
L_PAD, H0_PAD = 16, 64             # padded lane dims for the first two matmuls
H1, H2 = 256, 128
OUT, OUT_PAD = 5, 128              # lane-dense output


def _round_up(x, m):
    return ((x + m - 1) // m) * m


def my_net_kernel(x_ref, a_ref, bc_ref, w1_ref, b1_ref, w2_ref, b2_ref,
                  w3_ref, b3_ref, o_ref):
    # Conv1d(1->10, k=4, stride=1) + ReLU, folded into a (16, 64) matmul.
    h0 = jnp.maximum(
        jnp.dot(x_ref[...], a_ref[...], preferred_element_type=jnp.float32)
        + bc_ref[...], 0.0)
    # fl1: Linear(60->256) + ReLU (+ Dropout -> identity in eval)
    h1 = jnp.maximum(
        jnp.dot(h0, w1_ref[...], preferred_element_type=jnp.float32)
        + b1_ref[...], 0.0)
    # fl2: Linear(256->128) + ReLU (+ Dropout -> identity in eval)
    h2 = jnp.maximum(
        jnp.dot(h1, w2_ref[...], preferred_element_type=jnp.float32)
        + b2_ref[...], 0.0)
    # fl3: Linear(128->5, zero-padded to 128 cols) + ReLU; lane-dense store.
    o_ref[...] = jnp.maximum(
        jnp.dot(h2, w3_ref[...], preferred_element_type=jnp.float32)
        + b3_ref[...], 0.0)


def init_params(key):
    """Deterministic synthetic parameters (shapes match the nn.Module)."""
    ks = jax.random.split(key, 8)
    wc = jax.random.normal(ks[0], (C_OUT, KSZ), jnp.float32) * 0.10  # Conv1d weight
    bc = jax.random.normal(ks[1], (C_OUT,), jnp.float32) * 0.10      # Conv1d bias
    w1 = jax.random.normal(ks[2], (H0, H1), jnp.float32) * 0.05
    b1 = jax.random.normal(ks[3], (H1,), jnp.float32) * 0.05
    w2 = jax.random.normal(ks[4], (H1, H2), jnp.float32) * 0.05
    b2 = jax.random.normal(ks[5], (H2,), jnp.float32) * 0.05
    w3 = jax.random.normal(ks[6], (H2, OUT), jnp.float32) * 0.05
    b3 = jax.random.normal(ks[7], (OUT,), jnp.float32) * 0.05
    return dict(wc=wc, bc=bc, w1=w1, b1=b1, w2=w2, b2=b2, w3=w3, b3=b3)


def pack_params(params):
    """Host-side, one-time packing: fold the conv and zero-pad to lane-friendly shapes.

    A[i, c*T + t] = wc[c, i - t] for 0 <= i - t < K (else 0), so
    relu(x @ A + bc_flat) reproduces PyTorch's channel-major flatten of the
    conv output.  Padded rows/cols are zero everywhere, so padded output
    columns stay exactly 0 after bias + ReLU.
    """
    wc = np.asarray(params["wc"], np.float32)
    bc = np.asarray(params["bc"], np.float32)

    a = np.zeros((L_PAD, H0_PAD), np.float32)
    for c in range(C_OUT):
        for t in range(T_CONV):
            a[t:t + KSZ, c * T_CONV + t] = wc[c, :]
    bc_flat = np.zeros((1, H0_PAD), np.float32)
    bc_flat[0, :H0] = np.repeat(bc, T_CONV)

    w1 = np.zeros((H0_PAD, H1), np.float32)
    w1[:H0, :] = np.asarray(params["w1"], np.float32)
    b1 = np.asarray(params["b1"], np.float32).reshape(1, H1)

    w2 = np.asarray(params["w2"], np.float32)
    b2 = np.asarray(params["b2"], np.float32).reshape(1, H2)

    w3 = np.zeros((H2, OUT_PAD), np.float32)
    w3[:, :OUT] = np.asarray(params["w3"], np.float32)
    b3 = np.zeros((1, OUT_PAD), np.float32)
    b3[0, :OUT] = np.asarray(params["b3"], np.float32)

    packed = dict(a=a, bc=bc_flat, w1=w1, b1=b1, w2=w2, b2=b2, w3=w3, b3=b3)
    return {k: jnp.asarray(v) for k, v in packed.items()}


def my_net_forward(x_ncl, packed):
    B = x_ncl.shape[0]
    x2d = x_ncl[:, 0, :].astype(jnp.float32)                 # (B, 9)

    # Batch tiling: TILE_B multiple of 8 (f32 sublane); don't over-pad tiny B.
    tile_b = min(512, _round_up(B, 8))
    b_pad = _round_up(B, tile_b)
    x_p = jnp.zeros((b_pad, L_PAD), jnp.float32).at[:B, :L_IN].set(x2d)

    grid = (b_pad // tile_b,)

    def resident(arr):
        # Weights / biases: constant block index -> VMEM-resident, no re-DMA.
        return pl.BlockSpec(arr.shape, lambda i: (0,) * arr.ndim)

    flops = 2 * b_pad * (L_PAD * H0_PAD + H0_PAD * H1 + H1 * H2 + H2 * OUT_PAD)
    weight_bytes = 4 * (L_PAD * H0_PAD + H0_PAD + H0_PAD * H1 + H1
                        + H1 * H2 + H2 + H2 * OUT_PAD + OUT_PAD)
    bytes_accessed = 4 * b_pad * (L_PAD + OUT_PAD) + weight_bytes

    out = pl.pallas_call(
        my_net_kernel,
        out_shape=jax.ShapeDtypeStruct((b_pad, OUT_PAD), jnp.float32),
        grid=grid,
        in_specs=[
            pl.BlockSpec((tile_b, L_PAD), lambda i: (i, 0)),     # x tile streams
            resident(packed["a"]),
            resident(packed["bc"]),
            resident(packed["w1"]),
            resident(packed["b1"]),
            resident(packed["w2"]),
            resident(packed["b2"]),
            resident(packed["w3"]),
            resident(packed["b3"]),
        ],
        out_specs=pl.BlockSpec((tile_b, OUT_PAD), lambda i: (i, 0)),
        compiler_params=pltpu.CompilerParams(
            dimension_semantics=("parallel",)),
        cost_estimate=pl.CostEstimate(
            flops=flops, transcendentals=0, bytes_accessed=bytes_accessed),
    )(x_p, packed["a"], packed["bc"], packed["w1"], packed["b1"],
      packed["w2"], packed["b2"], packed["w3"], packed["b3"])

    return out[:B, :OUT]


def reference_forward(x_ncl, params):
    """Pure-JAX eval-mode reference mirroring the PyTorch module."""
    B = x_ncl.shape[0]
    x = x_ncl[:, 0, :].astype(jnp.float32)                   # (B, 9)
    wc, bc = params["wc"], params["bc"]
    conv = jnp.stack(
        [jnp.stack([x[:, t:t + KSZ] @ wc[c] + bc[c] for t in range(T_CONV)],
                   axis=-1)
         for c in range(C_OUT)], axis=1)                      # (B, 10, 6)
    h0 = jnp.maximum(conv, 0.0).reshape(B, -1)                # (B, 60)
    h1 = jnp.maximum(h0 @ params["w1"] + params["b1"], 0.0)
    h2 = jnp.maximum(h1 @ params["w2"] + params["b2"], 0.0)
    return jnp.maximum(h2 @ params["w3"] + params["b3"], 0.0)


if __name__ == "__main__":
    key = jax.random.PRNGKey(0)
    k_x, k_p = jax.random.split(key)

    # Conv1d(k=4) flattening to 10*6 implies input length 9: x is (B, 1, 9).
    B = 2
    x = jax.random.normal(k_x, (B, 1, 9), jnp.float32)
    params = init_params(k_p)
    packed = pack_params(params)    # one-time host-side fold + padding

    out = my_net_forward(x, packed)
    out = jax.block_until_ready(out)

    ref = reference_forward(x, params)
    assert out.shape == (B, OUT)
    assert jnp.allclose(out, ref, atol=1e-4, rtol=1e-4), (out, ref)

    print("KERNEL_OK")
</pallas_src>

<mosaic_0001>
module attributes {stable_mosaic.version = 11 : i64} {
  func.func @my_net_kernel(%arg0: i32, %arg1: memref<8x16xf32, #tpu.memory_space<vmem>>, %arg2: memref<16x64xf32, #tpu.memory_space<vmem>>, %arg3: memref<1x64xf32, #tpu.memory_space<vmem>>, %arg4: memref<64x256xf32, #tpu.memory_space<vmem>>, %arg5: memref<1x256xf32, #tpu.memory_space<vmem>>, %arg6: memref<256x128xf32, #tpu.memory_space<vmem>>, %arg7: memref<1x128xf32, #tpu.memory_space<vmem>>, %arg8: memref<128x128xf32, #tpu.memory_space<vmem>>, %arg9: memref<1x128xf32, #tpu.memory_space<vmem>>, %arg10: memref<8x128xf32, #tpu.memory_space<vmem>>) attributes {dimension_semantics = [#tpu.dimension_semantics<parallel>], iteration_bounds = array<i64: 1>, scalar_prefetch = 0 : i64, scratch_operands = 0 : i64, tpu.core_type = #tpu.core_type<tc>, window_params = [{transform_indices = @transform_0, window_bounds = array<i64: 8, 16>}, {pipeline_mode = #tpu.pipeline_mode<synchronous>, transform_indices = @transform_1, window_bounds = array<i64: 16, 64>}, {pipeline_mode = #tpu.pipeline_mode<synchronous>, transform_indices = @transform_2, window_bounds = array<i64: 1, 64>}, {pipeline_mode = #tpu.pipeline_mode<synchronous>, transform_indices = @transform_3, window_bounds = array<i64: 64, 256>}, {pipeline_mode = #tpu.pipeline_mode<synchronous>, transform_indices = @transform_4, window_bounds = array<i64: 1, 256>}, {pipeline_mode = #tpu.pipeline_mode<synchronous>, transform_indices = @transform_5, window_bounds = array<i64: 256, 128>}, {pipeline_mode = #tpu.pipeline_mode<synchronous>, transform_indices = @transform_6, window_bounds = array<i64: 1, 128>}, {pipeline_mode = #tpu.pipeline_mode<synchronous>, transform_indices = @transform_7, window_bounds = array<i64: 128, 128>}, {pipeline_mode = #tpu.pipeline_mode<synchronous>, transform_indices = @transform_8, window_bounds = array<i64: 1, 128>}, {transform_indices = @transform_9, window_bounds = array<i64: 8, 128>}]} {
    %c0 = arith.constant 0 : index
    %c0_0 = arith.constant 0 : index
    %0 = vector.load %arg1[%c0, %c0_0] : memref<8x16xf32, #tpu.memory_space<vmem>>, vector<8x16xf32>
    %c0_1 = arith.constant 0 : index
    %c0_2 = arith.constant 0 : index
    %1 = vector.load %arg2[%c0_1, %c0_2] : memref<16x64xf32, #tpu.memory_space<vmem>>, vector<16x64xf32>
    %cst = arith.constant dense<0.000000e+00> : vector<8x64xf32>
    %2 = tpu.matmul %0, %1, %cst {dimension_numbers = #tpu.dot_dimension_numbers<[1], [0], [0], [1], [0, 0, 1, 1], [], []>} : vector<8x16xf32>, vector<16x64xf32>, vector<8x64xf32> -> vector<8x64xf32>
    %c0_3 = arith.constant 0 : index
    %c0_4 = arith.constant 0 : index
    %3 = vector.load %arg3[%c0_3, %c0_4] : memref<1x64xf32, #tpu.memory_space<vmem>>, vector<1x64xf32>
    %4 = vector.broadcast %3 : vector<1x64xf32> to vector<8x64xf32>
    %5 = arith.addf %2, %4 : vector<8x64xf32>
    %cst_5 = arith.constant 0.000000e+00 : f32
    %6 = vector.broadcast %cst_5 : f32 to vector<8x64xf32>
    %7 = arith.maximumf %5, %6 : vector<8x64xf32>
    %c0_6 = arith.constant 0 : index
    %c0_7 = arith.constant 0 : index
    %8 = vector.load %arg4[%c0_6, %c0_7] : memref<64x256xf32, #tpu.memory_space<vmem>>, vector<64x256xf32>
    %cst_8 = arith.constant dense<0.000000e+00> : vector<8x256xf32>
    %9 = tpu.matmul %7, %8, %cst_8 {dimension_numbers = #tpu.dot_dimension_numbers<[1], [0], [0], [1], [0, 0, 1, 1], [], []>} : vector<8x64xf32>, vector<64x256xf32>, vector<8x256xf32> -> vector<8x256xf32>
    %c0_9 = arith.constant 0 : index
    %c0_10 = arith.constant 0 : index
    %10 = vector.load %arg5[%c0_9, %c0_10] : memref<1x256xf32, #tpu.memory_space<vmem>>, vector<1x256xf32>
    %11 = vector.broadcast %10 : vector<1x256xf32> to vector<8x256xf32>
    %12 = arith.addf %9, %11 : vector<8x256xf32>
    %cst_11 = arith.constant 0.000000e+00 : f32
    %13 = vector.broadcast %cst_11 : f32 to vector<8x256xf32>
    %14 = arith.maximumf %12, %13 : vector<8x256xf32>
    %c0_12 = arith.constant 0 : index
    %c0_13 = arith.constant 0 : index
    %15 = vector.load %arg6[%c0_12, %c0_13] : memref<256x128xf32, #tpu.memory_space<vmem>>, vector<256x128xf32>
    %cst_14 = arith.constant dense<0.000000e+00> : vector<8x128xf32>
    %16 = tpu.matmul %14, %15, %cst_14 {dimension_numbers = #tpu.dot_dimension_numbers<[1], [0], [0], [1], [0, 0, 1, 1], [], []>} : vector<8x256xf32>, vector<256x128xf32>, vector<8x128xf32> -> vector<8x128xf32>
    %c0_15 = arith.constant 0 : index
    %c0_16 = arith.constant 0 : index
    %17 = vector.load %arg7[%c0_15, %c0_16] : memref<1x128xf32, #tpu.memory_space<vmem>>, vector<1x128xf32>
    %18 = vector.broadcast %17 : vector<1x128xf32> to vector<8x128xf32>
    %19 = arith.addf %16, %18 : vector<8x128xf32>
    %cst_17 = arith.constant 0.000000e+00 : f32
    %20 = vector.broadcast %cst_17 : f32 to vector<8x128xf32>
    %21 = arith.maximumf %19, %20 : vector<8x128xf32>
    %c0_18 = arith.constant 0 : index
    %c0_19 = arith.constant 0 : index
    %22 = vector.load %arg8[%c0_18, %c0_19] : memref<128x128xf32, #tpu.memory_space<vmem>>, vector<128x128xf32>
    %cst_20 = arith.constant dense<0.000000e+00> : vector<8x128xf32>
    %23 = tpu.matmul %21, %22, %cst_20 {dimension_numbers = #tpu.dot_dimension_numbers<[1], [0], [0], [1], [0, 0, 1, 1], [], []>} : vector<8x128xf32>, vector<128x128xf32>, vector<8x128xf32> -> vector<8x128xf32>
    %c0_21 = arith.constant 0 : index
    %c0_22 = arith.constant 0 : index
    %24 = vector.load %arg9[%c0_21, %c0_22] : memref<1x128xf32, #tpu.memory_space<vmem>>, vector<1x128xf32>
    %25 = vector.broadcast %24 : vector<1x128xf32> to vector<8x128xf32>
    %26 = arith.addf %23, %25 : vector<8x128xf32>
    %cst_23 = arith.constant 0.000000e+00 : f32
    %27 = vector.broadcast %cst_23 : f32 to vector<8x128xf32>
    %28 = arith.maximumf %26, %27 : vector<8x128xf32>
    %c0_24 = arith.constant 0 : index
    %c0_25 = arith.constant 0 : index
    %29 = vector.load %arg10[%c0_24, %c0_25] : memref<8x128xf32, #tpu.memory_space<vmem>>, vector<8x128xf32>
    tpu.vector_store %arg10[%c0_24, %c0_25], %28 {strides = array<i32>} : memref<8x128xf32, #tpu.memory_space<vmem>>, vector<8x128xf32>,
    return
  }
  func.func @transform_0(%arg0: i32) -> (i32, i32) {
    %c0_i32 = arith.constant 0 : i32
    %c0_i32_0 = arith.constant 0 : i32
    return %arg0, %c0_i32 : i32, i32
  }
  func.func @transform_1(%arg0: i32) -> (i32, i32) {
    %c0_i32 = arith.constant 0 : i32
    %c0_i32_0 = arith.constant 0 : i32
    %c0_i32_1 = arith.constant 0 : i32
    return %c0_i32, %c0_i32_0 : i32, i32
  }
  func.func @transform_2(%arg0: i32) -> (i32, i32) {
    %c0_i32 = arith.constant 0 : i32
    %c0_i32_0 = arith.constant 0 : i32
    %c0_i32_1 = arith.constant 0 : i32
    return %c0_i32, %c0_i32_0 : i32, i32
  }
  func.func @transform_3(%arg0: i32) -> (i32, i32) {
    %c0_i32 = arith.constant 0 : i32
    %c0_i32_0 = arith.constant 0 : i32
    %c0_i32_1 = arith.constant 0 : i32
    return %c0_i32, %c0_i32_0 : i32, i32
  }
  func.func @transform_4(%arg0: i32) -> (i32, i32) {
    %c0_i32 = arith.constant 0 : i32
    %c0_i32_0 = arith.constant 0 : i32
    %c0_i32_1 = arith.constant 0 : i32
    return %c0_i32, %c0_i32_0 : i32, i32
  }
  func.func @transform_5(%arg0: i32) -> (i32, i32) {
    %c0_i32 = arith.constant 0 : i32
    %c0_i32_0 = arith.constant 0 : i32
    %c0_i32_1 = arith.constant 0 : i32
    return %c0_i32, %c0_i32_0 : i32, i32
  }
  func.func @transform_6(%arg0: i32) -> (i32, i32) {
    %c0_i32 = arith.constant 0 : i32
    %c0_i32_0 = arith.constant 0 : i32
    %c0_i32_1 = arith.constant 0 : i32
    return %c0_i32, %c0_i32_0 : i32, i32
  }
  func.func @transform_7(%arg0: i32) -> (i32, i32) {
    %c0_i32 = arith.constant 0 : i32
    %c0_i32_0 = arith.constant 0 : i32
    %c0_i32_1 = arith.constant 0 : i32
    return %c0_i32, %c0_i32_0 : i32, i32
  }
  func.func @transform_8(%arg0: i32) -> (i32, i32) {
    %c0_i32 = arith.constant 0 : i32
    %c0_i32_0 = arith.constant 0 : i32
    %c0_i32_1 = arith.constant 0 : i32
    return %c0_i32, %c0_i32_0 : i32, i32
  }
  func.func @transform_9(%arg0: i32) -> (i32, i32) {
    %c0_i32 = arith.constant 0 : i32
    %c0_i32_0 = arith.constant 0 : i32
    return %arg0, %c0_i32 : i32, i32
  }
}

</mosaic_0001>

<bundles_post_ra>
// kernel: tpu_custom_call.1
= control target key start
LH: loop header
LB: loop body
LE: loop exit
PB: predicated region body
PF: predicated region fallthrough
CT: control target
= control target key end

     0   :  { %14 = vsyncpa [#allocation3], 0  ;;  %s877_s0 = inlined_call_operand.hbm [shape: f32[8,16], index: 0, kind: input, shape index: {}]   ;;  %s878_s1 = inlined_call_operand.hbm [shape: f32[16,64], index: 1, kind: input, shape index: {}]   ;;  %s879_s2 = inlined_call_operand.vmem [shape: f32[1,64], index: 2, kind: input, shape index: {}]   ;;  %s880_s3 = inlined_call_operand.hbm [shape: f32[64,256], index: 3, kind: input, shape index: {}]   ;;  %s881_s4 = inlined_call_operand.vmem [shape: f32[1,256], index: 4, kind: input, shape index: {}]   ;;  %s882_s5 = inlined_call_operand.hbm [shape: f32[256,128], index: 5, kind: input, shape index: {}]   ;;  %s883_s6 = inlined_call_operand.vmem [shape: f32[1,128], index: 6, kind: input, shape index: {}]   ;;  %s884_s7 = inlined_call_operand.hbm [shape: f32[128,128], index: 7, kind: input, shape index: {}]   ;;  %s885_s8 = inlined_call_operand.vmem [shape: f32[1,128], index: 8, kind: input, shape index: {}]   ;;  %s886_s9 = inlined_call_operand.hbm [shape: f32[8,128], index: 9, kind: output, shape index: {}]  }
   0x1   :  { %15 = vsyncpa [#allocation6], 0 }
   0x2   :  { %16 = vsyncpa [#allocation9], 0 }
   0x3   :  { %17 = vsyncpa [#allocation4], 0  ;;  %s753_s30 = smov [#allocation5]  }
   0x4   :  { %s33_s10 = sshll.u32 %s753_s30, 4  ;;  %s34_s10 = int_to_ptr.vmem [resolvable:$true] %s33_s10 }
   0x5   :  { %s633_s11 = scalar_lea.vmem %s34_s10, 256  ;;  %p638_p1 = scmp.lt.s32.totalorder %s34_s10, %s34_s10 }
   0x6   :  { %p634_p0 = scmp.ne.s32.totalorder %s34_s10, %s633_s11  ;;  %p639_p2 = scmp.lt.s32.totalorder %s633_s11, %s633_s11 }
   0x8   :  { %p640_p3 = por %p639_p2, %p638_p1 }
   0xa   :  { %p641_p4 = pnand %p640_p3, %p634_p0 }
   0xc   :  { %644 = shalt.err (!%p641_p4)
}
   0xd   :  { %s754_s12 = smov 128   ;;  %s755_s13 = smov 8  }
   0xe   :  { %39 = dma.hbm_to_vmem [thread:$0]  %s878_s1, 256, %s34_s10, [#allocation6], %s754_s12, %s754_s12, %s755_s13  }
   0xf   :  { %s756_s16 = smov [#allocation8]   ;;  %s757_s18 = smov [#allocation2]  }
  0x10   :  { %s61_s17 = sshll.u32 %s756_s16, 4  ;;  %s24_s19 = sshll.u32 %s757_s18, 4  ;;  %s62_s17 = int_to_ptr.vmem [resolvable:$true] %s61_s17  ;;  %s25_s19 = int_to_ptr.vmem [resolvable:$true] %s24_s19 }
  0x11   :  { %s653_s20 = scalar_lea.vmem %s62_s17, 4096  ;;  %p658_p6 = scmp.lt.s32.totalorder %s62_s17, %s62_s17 }
  0x12   :  { %p654_p5 = scmp.ne.s32.totalorder %s62_s17, %s653_s20  ;;  %p659_p7 = scmp.lt.s32.totalorder %s653_s20, %s653_s20 }
  0x14   :  { %p660_p8 = por %p659_p7, %p658_p6 }
  0x16   :  { %p661_p9 = pnand %p660_p8, %p654_p5 }
  0x18   :  { %664 = shalt.err (!%p661_p9)
}
  0x19   :  { %67 = dma.hbm_to_vmem [thread:$0]  %s882_s5, 4096, %s62_s17, [#allocation9], %s754_s12, %s754_s12, %s755_s13  }
  0x1a   :  { %s673_s1 = scalar_lea.vmem %s25_s19, 128  ;;  %p678_p11 = scmp.lt.s32.totalorder %s25_s19, %s25_s19 }
  0x1b   :  { %p674_p10 = scmp.ne.s32.totalorder %s25_s19, %s673_s1  ;;  %p679_p12 = scmp.lt.s32.totalorder %s673_s1, %s673_s1 }
  0x1d   :  { %p680_p13 = por %p679_p12, %p678_p11 }
  0x1f   :  { %p681_p0 = pnand %p680_p13, %p674_p10 }
  0x21   :  { %684 = shalt.err (!%p681_p0)
}
  0x22   :  { %27 = dma.hbm_to_vmem [thread:$0]  %s877_s0, 128, %s25_s19, [#allocation3]  }
  0x23   :  { %s758_s25 = smov [#allocation7]  }
  0x24   :  { %s47_s26 = sshll.u32 %s758_s25, 4  ;;  %s48_s26 = int_to_ptr.vmem [resolvable:$true] %s47_s26 }
  0x25   :  { %s693_s27 = scalar_lea.vmem %s48_s26, 2048  ;;  %p698_p2 = scmp.lt.s32.totalorder %s48_s26, %s48_s26 }
  0x26   :  { %p694_p1 = scmp.ne.s32.totalorder %s48_s26, %s693_s27  ;;  %p699_p3 = scmp.lt.s32.totalorder %s693_s27, %s693_s27 }
  0x28   :  { %p700_p4 = por %p699_p3, %p698_p2 }
  0x2a   :  { %p701_p5 = pnand %p700_p4, %p694_p1 }
  0x2c   :  { %704 = shalt.err (!%p701_p5)
}
  0x2d   :  { %s759_s5 = smov 256   ;;  %s760_s28 = smov 16  }
  0x2e   :  { %53 = dma.hbm_to_vmem [thread:$0]  %s880_s3, 2048, %s48_s26, [#allocation6], %s759_s5, %s759_s5, %s760_s28  }
  0x2f   :  { %s761_s10 = smov [#allocation10]  }
  0x30   :  { %s75_s11 = sshll.u32 %s761_s10, 4  ;;  %s76_s11 = int_to_ptr.vmem [resolvable:$true] %s75_s11 }
  0x31   :  { %s713_s0 = scalar_lea.vmem %s76_s11, 2048  ;;  %p718_p7 = scmp.lt.s32.totalorder %s76_s11, %s76_s11 }
  0x32   :  { %p714_p6 = scmp.ne.s32.totalorder %s76_s11, %s713_s0  ;;  %p719_p8 = scmp.lt.s32.totalorder %s713_s0, %s713_s0 }
  0x34   :  { %p720_p9 = por %p719_p8, %p718_p7 }
  0x36   :  { %p721_p10 = pnand %p720_p9, %p714_p6 }
  0x38   :  { %724 = shalt.err (!%p721_p10)
}
  0x39   :  { %81 = dma.hbm_to_vmem [thread:$0]  %s884_s7, 2048, %s76_s11, [#allocation9], %s754_s12, %s754_s12, %s755_s13  }
  0x3a   :  { %745 = dma.done.wait [#allocation3], 128  }
  0x3b   :  { %746 = vsyncadd [#allocation3], 4294967168 }
  0x3c   :  { %747 = dma.done.wait [#allocation6], 2304  }
  0x3d   :  { %748 = vsyncadd [#allocation6], 4294964992 }
  0x3e   :  { %749 = dma.done.wait [#allocation9], 6144  }
  0x3f   :  { %750 = vsyncadd [#allocation9], 4294961152  ;;  %v762_v0 = vmov 0.0   ;;  %vm763_vm0 = vmmov 0   ;;  %v101_v1 = vld [vmem:[#allocation5 + $0x8] sm:$0xff]  ;;  %v100_v2 = vld [vmem:[#allocation5] sm:$0xff] }
  0x40   :  { %571 = vmatprep.subr.mxu0 %v762_v0  ;;  %575 = vmatprep.mubr.msk.f32.mxu0 %vm763_vm0, %v762_v0  ;;  %v99_v3 = vld [vmem:[#allocation2] sm:$0xff]  ;;  %vm109_vm1 = vcmask 130048   ;;  %v199_v4 = vld [vmem:[#allocation7 + $0x78] sm:$0xff]  ;;  %v198_v5 = vld [vmem:[#allocation7 + $0x70] sm:$0xff]  ;;  %vm212_vm2 = vcmask 523264   ;;  %s764_s18 = smov [#allocation11]  }
  0x41   :  { %280 = vmatprep.mubr.f32.mxu1 %v762_v0  ;;  %572 = vmatpush3.msra.mxu0 %v101_v1  ;;  %v197_v6 = vld [vmem:[#allocation7 + $0x68] sm:$0xff]  ;;  %v196_v7 = vld [vmem:[#allocation7 + $0x60] sm:$0xff]  ;;  %v195_v8 = vld [vmem:[#allocation7 + $0x58] sm:$0xff]  ;;  %s500_s19 = sshll.u32 %s764_s18, 4  ;;  %s501_s19 = int_to_ptr.vmem [resolvable:$true] %s500_s19 }
  0x42   :  { %573 = vmatprep.subr.mxu0 %v762_v0  ;;  %232 = vmatprep.subr.mxu1 %v199_v4  ;;  %v194_v9 = vld [vmem:[#allocation7 + $0x50] sm:$0xff]  ;;  %v193_v10 = vld [vmem:[#allocation7 + $0x48] sm:$0xff]  ;;  %v192_v11 = vld [vmem:[#allocation7 + $0x40] sm:$0xff]  ;;  %s725_s20 = scalar_lea.vmem %s501_s19, 128  ;;  %p730_p12 = scmp.lt.s32.totalorder %s501_s19, %s501_s19 }
  0x43   :  { %574 = vmatpush3.msra.mxu0 %v100_v2  ;;  %233 = vmatpush1.msra.mxu1 %v198_v5  ;;  %v191_v12 = vld [vmem:[#allocation7 + $0x38] sm:$0xff]  ;;  %v190_v13 = vld [vmem:[#allocation7 + $0x30] sm:$0xff]  ;;  %v189_v14 = vld [vmem:[#allocation7 + $0x28] sm:$0xff]  ;;  %v202_v5 = vlaneseq  ;;  %p726_p11 = scmp.ne.s32.totalorder %s501_s19, %s725_s20  ;;  %p731_p13 = scmp.lt.s32.totalorder %s725_s20, %s725_s20 }
  0x44   :  { %576 = vmatmul.mubr.msk.f32.vlgmr.msra.gmra.mxu0 %vm109_vm1, %v99_v3  ;;  %234 = vmatprep.subr.mxu1 %v197_v6  ;;  %v188_v15 = vld [vmem:[#allocation7 + $0x20] sm:$0xff]  ;;  %v187_v16 = vld [vmem:[#allocation7 + $0x18] sm:$0xff]  ;;  %v186_v17 = vld [vmem:[#allocation7 + $0x10] sm:$0xff] }
  0x45   :  { %235 = vmatpush1.msra.mxu1 %v196_v7  ;;  %v185_v18 = vld [vmem:[#allocation7 + $0x8] sm:$0xff]  ;;  %v184_v19 = vld [vmem:[#allocation7] sm:$0xff]  ;;  %v320_v20 = vld [vmem:[#allocation8 + $0xf8] sm:$0xff]  ;;  %v203_v6 = vshrl.u32 %v202_v5, 7  ;;  %p732_p0 = por %p731_p13, %p730_p12 }
  0x46   :  { %236 = vmatprep.subr.mxu1 %v195_v8  ;;  %v304_v21 = vld [vmem:[#allocation8 + $0x78] sm:$0xff]  ;;  %v319_v22 = vld [vmem:[#allocation8 + $0xf0] sm:$0xff]  ;;  %519 = vmatprep.subr.mxu0 %v320_v20  ;;  %v318_v24 = vld [vmem:[#allocation8 + $0xe8] sm:$0xff] }
  0x47   :  { %237 = vmatpush1.msra.mxu1 %v194_v9  ;;  %v303_v23 = vld [vmem:[#allocation8 + $0x70] sm:$0xff]  ;;  %520 = vmatpush3.msra.mxu0 %v304_v21  ;;  %v302_v25 = vld [vmem:[#allocation8 + $0x68] sm:$0xff]  ;;  %v317_v26 = vld [vmem:[#allocation8 + $0xe0] sm:$0xff]  ;;  %v204_v7 = vsub.s32 0, %v203_v6  ;;  %v208_v9 = vsub.s32 1, %v203_v6  ;;  %p733_p1 = pnand %p732_p0, %p726_p11 }
  0x48   :  { %238 = vmatprep.subr.mxu1 %v193_v10  ;;  %521 = vmatprep.subr.mxu0 %v319_v22  ;;  %v301_v27 = vld [vmem:[#allocation8 + $0x60] sm:$0xff]  ;;  %v316_v28 = vld [vmem:[#allocation8 + $0xd8] sm:$0xff]  ;;  %v315_v30 = vld [vmem:[#allocation8 + $0xd0] sm:$0xff] }
  0x49   :  { %239 = vmatpush1.msra.mxu1 %v192_v11  ;;  %522 = vmatpush3.msra.mxu0 %v303_v23  ;;  %v300_v29 = vld [vmem:[#allocation8 + $0x58] sm:$0xff]  ;;  %v299_v31 = vld [vmem:[#allocation8 + $0x50] sm:$0xff]  ;;  %v314_v32 = vld [vmem:[#allocation8 + $0xc8] sm:$0xff] }
  0x4a   :  { %240 = vmatprep.subr.mxu1 %v191_v12  ;;  %523 = vmatprep.subr.mxu0 %v318_v24  ;;  %v298_v33 = vld [vmem:[#allocation8 + $0x48] sm:$0xff]  ;;  %v313_v34 = vld [vmem:[#allocation8 + $0xc0] sm:$0xff]  ;;  %v312_v36 = vld [vmem:[#allocation8 + $0xb8] sm:$0xff] }
  0x4b   :  { %241 = vmatpush1.msra.mxu1 %v190_v13  ;;  %524 = vmatpush3.msra.mxu0 %v302_v25  ;;  %v297_v35 = vld [vmem:[#allocation8 + $0x40] sm:$0xff]  ;;  %v296_v37 = vld [vmem:[#allocation8 + $0x38] sm:$0xff]  ;;  %v311_v38 = vld [vmem:[#allocation8 + $0xb0] sm:$0xff] }
  0x4c   :  { %242 = vmatprep.subr.mxu1 %v189_v14  ;;  %525 = vmatprep.subr.mxu0 %v317_v26  ;;  %v295_v39 = vld [vmem:[#allocation8 + $0x30] sm:$0xff]  ;;  %v310_v40 = vld [vmem:[#allocation8 + $0xa8] sm:$0xff]  ;;  %v309_v42 = vld [vmem:[#allocation8 + $0xa0] sm:$0xff] }
  0x4d   :  { %243 = vmatpush1.msra.mxu1 %v188_v15  ;;  %526 = vmatpush3.msra.mxu0 %v301_v27  ;;  %v294_v41 = vld [vmem:[#allocation8 + $0x28] sm:$0xff]  ;;  %v293_v43 = vld [vmem:[#allocation8 + $0x20] sm:$0xff]  ;;  %v308_v49 = vld [vmem:[#allocation8 + $0x98] sm:$0xff] }
  0x4e   :  { %244 = vmatprep.subr.mxu1 %v187_v16  ;;  %527 = vmatprep.subr.mxu0 %v316_v28  ;;  %v511_v44 = vld [vmem:[%s879_s2] ss:$0 sm:$0xff]  ;;  %v292_v50 = vld [vmem:[#allocation8 + $0x18] sm:$0xff]  ;;  %v307_v51 = vld [vmem:[#allocation8 + $0x90] sm:$0xff] }
  0x4f   :  { %245 = vmatpush1.msra.mxu1 %v186_v17  ;;  %528 = vmatpush3.msra.mxu0 %v300_v29  ;;  %v291_v52 = vld [vmem:[#allocation8 + $0x10] sm:$0xff]  ;;  %v306_v53 = vld [vmem:[#allocation8 + $0x88] sm:$0xff]  ;;  %v305_v55 = vld [vmem:[#allocation8 + $0x80] sm:$0xff] }
  0x50   :  { %246 = vmatprep.subr.mxu1 %v185_v18  ;;  %529 = vmatprep.subr.mxu0 %v315_v30  ;;  %v290_v54 = vld [vmem:[#allocation8 + $0x8] sm:$0xff]  ;;  %v289_v56 = vld [vmem:[#allocation8] sm:$0xff]  ;;  %v414_v57 = vld [vmem:[#allocation10 + $0x78] sm:$0xff] }
  0x51   :  { %247 = vmatpush1.msra.mxu1 %v184_v19  ;;  %530 = vmatpush3.msra.mxu0 %v299_v31  ;;  %v413_v58 = vld [vmem:[#allocation10 + $0x70] sm:$0xff]  ;;  %v412_v59 = vld [vmem:[#allocation10 + $0x68] sm:$0xff]  ;;  %v411_v60 = vld [vmem:[#allocation10 + $0x60] sm:$0xff] }
  0x52   :  { %578 = vmatprep.subr.mxu1 %v762_v0  ;;  %531 = vmatprep.subr.mxu0 %v314_v32  ;;  %v410_v61 = vld [vmem:[#allocation10 + $0x58] sm:$0xff]  ;;  %v409_v62 = vld [vmem:[#allocation10 + $0x50] sm:$0xff]  ;;  %v408_v63 = vld [vmem:[#allocation10 + $0x48] sm:$0xff] }
  0x53   :  { %532 = vmatpush3.msra.mxu0 %v298_v33  ;;  %v407_v1 = vld [vmem:[#allocation10 + $0x40] sm:$0xff]  ;;  %v406_v2 = vld [vmem:[#allocation10 + $0x38] sm:$0xff]  ;;  %v405_v3 = vld [vmem:[#allocation10 + $0x30] sm:$0xff] }
  0x54   :  { %533 = vmatprep.subr.mxu0 %v313_v34  ;;  %v404_v4 = vld [vmem:[#allocation10 + $0x28] sm:$0xff]  ;;  %v403_v18 = vld [vmem:[#allocation10 + $0x20] sm:$0xff]  ;;  %v402_v19 = vld [vmem:[#allocation10 + $0x18] sm:$0xff] }
  0x55   :  { %534 = vmatpush3.msra.mxu0 %v297_v35  ;;  %v200_v8 = vld [vmem:[%s881_s4] sm:$0x3]  ;;  %v401_v20 = vld [vmem:[#allocation10 + $0x10] sm:$0xff]  ;;  %v399_v22 = vld [vmem:[#allocation10] sm:$0xff] }
  0x56   :  { %535 = vmatprep.subr.mxu0 %v312_v36  ;;  %v205_v10 = vrot.slane %v200_v8, %v204_v7  ;;  %v209_v11 = vrot.slane %v200_v8, %v208_v9  ;;  %v400_v21 = vld [vmem:[#allocation10 + $0x8] sm:$0xff] }
  0x57   :  { %536 = vmatpush3.msra.mxu0 %v296_v37  ;;  %v514_v24 = vld [vmem:[%s883_s6] ss:$0 sm:$0xff] }
  0x58   :  { %537 = vmatprep.subr.mxu0 %v311_v38  ;;  %v515_v29 = vld [vmem:[%s885_s8] ss:$0 sm:$0xff] }
  0x59   :  { %538 = vmatpush3.msra.mxu0 %v295_v39 }
  0x5a   :  { %539 = vmatprep.subr.mxu0 %v310_v40 }
  0x5b   :  { %540 = vmatpush3.msra.mxu0 %v294_v41 }
  0x5c   :  { %541 = vmatprep.subr.mxu0 %v309_v42 }
  0x5d   :  { %542 = vmatpush3.msra.mxu0 %v293_v43 }
  0x5e   :  { %543 = vmatprep.subr.mxu0 %v308_v49 }
  0x5f   :  { %544 = vmatpush3.msra.mxu0 %v292_v50 }
  0x60   :  { %545 = vmatprep.subr.mxu0 %v307_v51 }
  0x61   :  { %546 = vmatpush3.msra.mxu0 %v291_v52 }
  0x62   :  { %547 = vmatprep.subr.mxu0 %v306_v53 }
  0x63   :  { %548 = vmatpush3.msra.mxu0 %v290_v54 }
  0x64   :  { %549 = vmatprep.subr.mxu0 %v305_v55 }
  0x65   :  { %550 = vmatpush3.msra.mxu0 %v289_v56 }
 0x104   :  { %v179_v45 = vpop.f32.mrf.mxu0 }
 0x105   :  { %v180_v46 = vadd.f32 %v511_v44, %v179_v45 }
 0x106   :  { %v577_v47 = vpop.f32.mrf.mxu0 }
 0x107   :  { %v183_v48 = vmax.f32 %v180_v46, 0.0 }
 0x109   :  { %513 = vmatmul.mubr.msk.f32.vlgmr.msra.gmra.mxu1 %vm212_vm2, %v183_v48 }
 0x10a   :  { %610 = vmatprep.mubr.msk.f32.mxu1 %vm763_vm0, %v762_v0  ;;  %579 = vmatpush3.msra.mxu1 %v414_v57 }
 0x10b   :  { %580 = vmatprep.subr.mxu1 %v762_v0 }
 0x10c   :  { %581 = vmatpush3.msra.mxu1 %v413_v58 }
 0x10d   :  { %582 = vmatprep.subr.mxu1 %v762_v0 }
 0x10e   :  { %583 = vmatpush3.msra.mxu1 %v412_v59 }
 0x10f   :  { %584 = vmatprep.subr.mxu1 %v762_v0 }
 0x110   :  { %585 = vmatpush3.msra.mxu1 %v411_v60 }
 0x111   :  { %586 = vmatprep.subr.mxu1 %v762_v0 }
 0x112   :  { %587 = vmatpush3.msra.mxu1 %v410_v61 }
 0x113   :  { %588 = vmatprep.subr.mxu1 %v762_v0 }
 0x114   :  { %589 = vmatpush3.msra.mxu1 %v409_v62 }
 0x115   :  { %590 = vmatprep.subr.mxu1 %v762_v0 }
 0x116   :  { %591 = vmatpush3.msra.mxu1 %v408_v63 }
 0x117   :  { %592 = vmatprep.subr.mxu1 %v762_v0 }
 0x118   :  { %593 = vmatpush3.msra.mxu1 %v407_v1 }
 0x119   :  { %594 = vmatprep.subr.mxu1 %v762_v0 }
 0x11a   :  { %595 = vmatpush3.msra.mxu1 %v406_v2 }
 0x11b   :  { %596 = vmatprep.subr.mxu1 %v762_v0 }
 0x11c   :  { %597 = vmatpush3.msra.mxu1 %v405_v3 }
 0x11d   :  { %598 = vmatprep.subr.mxu1 %v762_v0 }
 0x11e   :  { %599 = vmatpush3.msra.mxu1 %v404_v4 }
 0x11f   :  { %600 = vmatprep.subr.mxu1 %v762_v0 }
 0x120   :  { %601 = vmatpush3.msra.mxu1 %v403_v18 }
 0x121   :  { %602 = vmatprep.subr.mxu1 %v762_v0 }
 0x122   :  { %603 = vmatpush3.msra.mxu1 %v402_v19 }
 0x123   :  { %604 = vmatprep.subr.mxu1 %v762_v0 }
 0x124   :  { %605 = vmatpush3.msra.mxu1 %v401_v20 }
 0x125   :  { %606 = vmatprep.subr.mxu1 %v762_v0 }
 0x126   :  { %607 = vmatpush3.msra.mxu1 %v400_v21 }
 0x127   :  { %608 = vmatprep.subr.mxu1 %v762_v0 }
 0x128   :  { %609 = vmatpush3.msra.mxu1 %v399_v22 }
 0x1c9   :  { %v282_v12 = vpop.f32.mrf.mxu1 }
 0x1ca   :  { %v283_v13 = vadd.f32 %v282_v12, %v205_v10 }
 0x1cb   :  { %v284_v14 = vpop.f32.mrf.mxu1 }
 0x1cc   :  { %v285_v15 = vadd.f32 %v284_v14, %v209_v11  ;;  %v287_v17 = vmax.f32 %v283_v13, 0.0 }
 0x1ce   :  { %v288_v16 = vmax.f32 %v285_v15, 0.0 }
 0x1d0   :  { %392 = vmatprep.mubr.f32.mxu0 %v288_v16 }
 0x1d1   :  { %393 = vmatmul.mubr.f32.vlgmr.msra.gmra.mxu0 %v287_v17 }
 0x291   :  { %v551_v23 = vpop.f32.mrf.mxu0 }
 0x293   :  { %v552_v25 = vpop.f32.mrf.mxu0 }
 0x294   :  { %v553_v26 = vadd.f32 %v552_v25, %v551_v23 }
 0x296   :  { %v395_v27 = vadd.f32 %v553_v26, %v514_v24 }
 0x298   :  { %v398_v28 = vmax.f32 %v395_v27, 0.0 }
 0x29a   :  { %611 = vmatmul.mubr.f32.vlgmr.msra.gmra.mxu1 %v398_v28 }
 0x35a   :  { %v488_v30 = vpop.f32.mrf.mxu1 }
 0x35b   :  { %v489_v0 = vadd.f32 %v515_v29, %v488_v30 }
 0x35c   :  { %v612_v31 = vpop.f32.mrf.mxu1 }
 0x35d   :  { %v492_v32 = vmax.f32 %v489_v0, 0.0 }
 0x35f   :  { %493 = vst [vmem:[#allocation11] sm:$0xff] %v492_v32 }
 0x360   :  { %736 = shalt.err (!%p733_p1)
}
 0x361   :  { %503 = dma.vmem_to_hbm [thread:$0]  %s501_s19, 128, %s886_s9, [#allocation4]  }
 0x362   :  { %751 = dma.done.wait [#allocation4], 128  }
 0x363   :  { %752 = vsyncadd [#allocation4], 4294967168 }
 0x364   :  { %507 = vsyncpa [#allocation3], 1 }
 0x365   :  { %508 = vsyncpa [#allocation6], 1 }
 0x366   :  { %509 = vsyncpa [#allocation9], 1 }
 0x367   :  { %510 = vsyncpa [#allocation4], 1 }

</bundles_post_ra>
